<compile_context>
chip_gen: v7x
topology: tpu7x:2x2x1
jax: 0.10.0
libtpu: 0.0.40
codegen_flags: <defaults>
</compile_context>

<pallas_src>
import jax
import jax.numpy as jnp
from jax.experimental import pallas as pl
from jax.experimental.pallas import tpu as pltpu

LANE = 128  # vreg lane width


def _select_tuning():
    """Per-generation (tile rows, explicit VMEM limit, shard count)."""
    kind = ""
    try:
        kind = jax.devices()[0].device_kind.lower()
    except Exception:
        pass
    if ("v5 lite" in kind) or ("v5e" in kind) or ("v5lite" in kind):
        # v5e: slower HBM -> 2 MiB/input tiles are enough; default scoped VMEM
        # is only 16 MiB, so raise it explicitly.
        return 4096, 32 * 1024 * 1024, 1
    tile_r = 8192                       # 4 MiB per f32 input tile
    vmem_limit = 56 * 1024 * 1024       # safe on v7x's 64 MiB/TC, ample on v6e
    shards = 2 if (("v7" in kind) or ("7x" in kind)) else 1  # 2 TCs on v7x
    return tile_r, vmem_limit, shards


def _make_kernel(row_block, num_blocks, blocks_per_shard, guard_oob):
    fold8 = (row_block % 8 == 0)

    def kernel(pred_ref, target_ref, mask_ref, sq_out_ref, msum_out_ref, acc_ref):
        i = pl.program_id(1)  # row-block index within this shard (reduction axis)

        @pl.when(i == 0)
        def _init():
            acc_ref[...] = jnp.zeros_like(acc_ref)

        def _accumulate():
            # Compute the residual in f32 *before* subtracting (bf16-safe);
            # the extra casts are free under the HBM bound.
            p = pred_ref[...].astype(jnp.float32)
            t = target_ref[...].astype(jnp.float32)
            m = mask_ref[...].astype(jnp.float32)
            d = p * m - t
            sq = d * d
            if fold8:
                # Fold (row_block, LANE) into a vreg-shaped (8, LANE) accumulator
                # with pure elementwise VPU adds (reshape preserves (8,128) tiles).
                r = row_block // 8
                acc_ref[0] += jnp.sum(sq.reshape(r, 8, LANE), axis=0)
                acc_ref[1] += jnp.sum(m.reshape(r, 8, LANE), axis=0)
            else:
                # Tiny single-block inputs (row_block == rows, not a multiple of 8).
                acc_ref[0, 0:1, :] += jnp.sum(sq, axis=0, keepdims=True)
                acc_ref[1, 0:1, :] += jnp.sum(m, axis=0, keepdims=True)

        if guard_oob:
            # Grid over-covers num_blocks (odd block count split over 2 shards);
            # index_map clamps the DMA in-bounds, and we skip the duplicate here.
            blk = pl.program_id(0) * blocks_per_shard + i
            pl.when(blk < num_blocks)(_accumulate)
        else:
            _accumulate()

        @pl.when(i == blocks_per_shard - 1)
        def _finish():
            # In-kernel reduction to two scalars per shard (XLU rides a free slot
            # under the DMA bound); only a scalar add + divide remain in JAX.
            sq_lane = jnp.sum(acc_ref[0], axis=1, keepdims=True)    # (8, 1)
            m_lane = jnp.sum(acc_ref[1], axis=1, keepdims=True)     # (8, 1)
            sq_out_ref[0] = jnp.sum(sq_lane, axis=0, keepdims=True)   # (1, 1)
            msum_out_ref[0] = jnp.sum(m_lane, axis=0, keepdims=True)  # (1, 1)

    return kernel


def masked_mse_loss(pred, target, mask):
    assert pred.shape == target.shape == mask.shape
    n = pred.size
    tile_r, vmem_limit, shards = _select_tuning()

    # Lane-dense (rows, 128) view of the flattened inputs.  Free when n is a
    # multiple of 128; otherwise pad only to the next lane multiple (one small
    # copy, rare).  Padded zeros contribute 0 to both sums.
    rows = pl.cdiv(n, LANE)
    lane_pad = rows * LANE - n

    def prep(x):
        x = x.reshape(-1)
        if lane_pad:
            x = jnp.pad(x, (0, lane_pad))
        return x.reshape(rows, LANE)

    p2, t2, m2 = prep(pred), prep(target), prep(mask)

    # Row-block tiling: blocks always tile the array exactly (no partial
    # blocks).  Any row-tail (< 1 block, only when rows > tile_r and not a
    # multiple) is folded into the bounded JAX epilogue below.
    row_block = tile_r if rows >= tile_r else rows
    num_blocks = rows // row_block
    tail_rows = rows - num_blocks * row_block

    shards = min(shards, num_blocks)
    blocks_per_shard = pl.cdiv(num_blocks, shards)
    guard_oob = shards * blocks_per_shard != num_blocks

    def in_map(s, i):
        b = s * blocks_per_shard + i
        if guard_oob:
            b = jnp.minimum(b, num_blocks - 1)  # keep the DMA in bounds
        return (b, 0)

    in_spec = pl.BlockSpec((row_block, LANE), in_map)
    out_spec = pl.BlockSpec((1, 1, 1), lambda s, i: (s, 0, 0))

    elems = num_blocks * row_block * LANE
    cost = pl.CostEstimate(
        flops=5 * elems,  # mul, sub, square, 2 accumulator adds per element
        transcendentals=0,
        bytes_accessed=elems * sum(x.dtype.itemsize for x in (p2, t2, m2))
        + shards * 2 * 4,
    )

    sq_parts, m_parts = pl.pallas_call(
        _make_kernel(row_block, num_blocks, blocks_per_shard, guard_oob),
        out_shape=(jax.ShapeDtypeStruct((shards, 1, 1), jnp.float32),
                   jax.ShapeDtypeStruct((shards, 1, 1), jnp.float32)),
        grid_spec=pltpu.PrefetchScalarGridSpec(
            num_scalar_prefetch=0,
            grid=(shards, blocks_per_shard),
            in_specs=[in_spec, in_spec, in_spec],
            out_specs=(out_spec, out_spec),
            scratch_shapes=[pltpu.VMEM((2, 8, LANE), jnp.float32)],
        ),
        compiler_params=pltpu.CompilerParams(
            # TODO(synk): on v7x, switch the leading axis to pltpu.CORE_PARALLEL
            # if a profile shows one TensorCore idle under plain "parallel".
            dimension_semantics=("parallel", "arbitrary"),
            vmem_limit_bytes=vmem_limit,
        ),
        cost_estimate=cost,
    )(p2, t2, m2)

    sq_sum = jnp.sum(sq_parts)
    mask_sum = jnp.sum(m_parts)

    if tail_rows:
        # < one row-block of leftover rows; bounded extra work, rare sizes only.
        start = num_blocks * row_block
        pt = p2[start:, :].astype(jnp.float32)
        tt = t2[start:, :].astype(jnp.float32)
        mt = m2[start:, :].astype(jnp.float32)
        dt = pt * mt - tt
        sq_sum = sq_sum + jnp.sum(dt * dt)
        mask_sum = mask_sum + jnp.sum(mt)

    # NOTE: matches PyTorch -- an all-zero mask yields inf/nan.
    return sq_sum / mask_sum


if __name__ == "__main__":
    key = jax.random.PRNGKey(0)
    k1, k2, k3 = jax.random.split(key, 3)

    batch, seq_len = 2, 8  # small shapes consistent with "batch*seq_len"
    pred = jax.random.normal(k1, (batch, seq_len), dtype=jnp.float32)
    target = jax.random.normal(k2, (batch, seq_len), dtype=jnp.float32)
    # binary mask with at least some ones (callers may pass int8/bool masks too)
    mask = (jax.random.uniform(k3, (batch, seq_len)) > 0.3).astype(jnp.float32)

    loss = masked_mse_loss(pred, target, mask)
    loss = jax.block_until_ready(loss)

    # Reference check in plain JAX
    ref = jnp.sum((pred * mask - target) ** 2) / jnp.sum(mask)
    assert jnp.allclose(loss, ref, rtol=1e-5, atol=1e-5), (loss, ref)

    print("KERNEL_OK")
</pallas_src>

<mosaic_0001>
module attributes {stable_mosaic.version = 11 : i64} {
  func.func @kernel(%arg0: i32, %arg1: i32, %arg2: memref<1x128xf32, #tpu.memory_space<vmem>>, %arg3: memref<1x128xf32, #tpu.memory_space<vmem>>, %arg4: memref<1x128xf32, #tpu.memory_space<vmem>>, %arg5: memref<1x1x1xf32, #tpu.memory_space<vmem>>, %arg6: memref<1x1x1xf32, #tpu.memory_space<vmem>>, %arg7: memref<2x8x128xf32, #tpu.memory_space<vmem>>) attributes {dimension_semantics = [#tpu.dimension_semantics<parallel>, #tpu.dimension_semantics<arbitrary>], iteration_bounds = array<i64: 1, 1>, scalar_prefetch = 0 : i64, scratch_operands = 1 : i64, tpu.core_type = #tpu.core_type<tc>, window_params = [{transform_indices = @transform_0, window_bounds = array<i64: 1, 128>}, {transform_indices = @transform_1, window_bounds = array<i64: 1, 128>}, {transform_indices = @transform_2, window_bounds = array<i64: 1, 128>}, {transform_indices = @transform_3, window_bounds = array<i64: 1, 1, 1>}, {transform_indices = @transform_4, window_bounds = array<i64: 1, 1, 1>}]} {
    %c0_i32 = arith.constant 0 : i32
    %0 = arith.cmpi eq, %arg1, %c0_i32 : i32
    %1 = arith.extui %0 : i1 to i32
    %c0_i32_0 = arith.constant 0 : i32
    %2 = arith.cmpi ne, %1, %c0_i32_0 : i32
    scf.if %2 {
      %cst_20 = arith.constant 0.000000e+00 : f32
      %28 = vector.broadcast %cst_20 : f32 to vector<2x8x128xf32>
      %c0_21 = arith.constant 0 : index
      %c0_22 = arith.constant 0 : index
      %c0_23 = arith.constant 0 : index
      %29 = vector.load %arg7[%c0_21, %c0_22, %c0_23] : memref<2x8x128xf32, #tpu.memory_space<vmem>>, vector<2x8x128xf32>
      tpu.vector_store %arg7[%c0_21, %c0_22, %c0_23], %28 {strides = array<i32>} : memref<2x8x128xf32, #tpu.memory_space<vmem>>, vector<2x8x128xf32>,
    } else {
    }
    %c0 = arith.constant 0 : index
    %c0_1 = arith.constant 0 : index
    %3 = vector.load %arg2[%c0, %c0_1] : memref<1x128xf32, #tpu.memory_space<vmem>>, vector<1x128xf32>
    %c0_2 = arith.constant 0 : index
    %c0_3 = arith.constant 0 : index
    %4 = vector.load %arg3[%c0_2, %c0_3] : memref<1x128xf32, #tpu.memory_space<vmem>>, vector<1x128xf32>
    %c0_4 = arith.constant 0 : index
    %c0_5 = arith.constant 0 : index
    %5 = vector.load %arg4[%c0_4, %c0_5] : memref<1x128xf32, #tpu.memory_space<vmem>>, vector<1x128xf32>
    %6 = arith.mulf %3, %5 : vector<1x128xf32>
    %7 = arith.subf %6, %4 : vector<1x128xf32>
    %8 = arith.mulf %7, %7 : vector<1x128xf32>
    %c0_6 = arith.constant 0 : index
    %c0_7 = arith.constant 0 : index
    %c0_8 = arith.constant 0 : index
    %9 = vector.load %arg7[%c0_6, %c0_7, %c0_8] : memref<2x8x128xf32, #tpu.memory_space<vmem>>, vector<1x1x128xf32>
    %10 = vector.shape_cast %9 : vector<1x1x128xf32> to vector<1x128xf32>
    %cst = arith.constant dense<0.000000e+00> : vector<128xf32>
    %11 = vector.multi_reduction <add>, %8, %cst [0] : vector<1x128xf32> to vector<128xf32>
    %12 = vector.shape_cast %11 : vector<128xf32> to vector<1x128xf32>
    %13 = arith.addf %10, %12 : vector<1x128xf32>
    %c0_9 = arith.constant 0 : index
    %c0_10 = arith.constant 0 : index
    %c0_11 = arith.constant 0 : index
    %14 = vector.load %arg7[%c0_9, %c0_10, %c0_11] : memref<2x8x128xf32, #tpu.memory_space<vmem>>, vector<1x1x128xf32>
    %15 = vector.shape_cast %14 : vector<1x1x128xf32> to vector<1x128xf32>
    %16 = vector.shape_cast %13 : vector<1x128xf32> to vector<1x1x128xf32>
    tpu.vector_store %arg7[%c0_9, %c0_10, %c0_11], %16 {strides = array<i32>} : memref<2x8x128xf32, #tpu.memory_space<vmem>>, vector<1x1x128xf32>,
    %c1 = arith.constant 1 : index
    %c0_12 = arith.constant 0 : index
    %c0_13 = arith.constant 0 : index
    %17 = vector.load %arg7[%c1, %c0_12, %c0_13] : memref<2x8x128xf32, #tpu.memory_space<vmem>>, vector<1x1x128xf32>
    %18 = vector.shape_cast %17 : vector<1x1x128xf32> to vector<1x128xf32>
    %cst_14 = arith.constant dense<0.000000e+00> : vector<128xf32>
    %19 = vector.multi_reduction <add>, %5, %cst_14 [0] : vector<1x128xf32> to vector<128xf32>
    %20 = vector.shape_cast %19 : vector<128xf32> to vector<1x128xf32>
    %21 = arith.addf %18, %20 : vector<1x128xf32>
    %c1_15 = arith.constant 1 : index
    %c0_16 = arith.constant 0 : index
    %c0_17 = arith.constant 0 : index
    %22 = vector.load %arg7[%c1_15, %c0_16, %c0_17] : memref<2x8x128xf32, #tpu.memory_space<vmem>>, vector<1x1x128xf32>
    %23 = vector.shape_cast %22 : vector<1x1x128xf32> to vector<1x128xf32>
    %24 = vector.shape_cast %21 : vector<1x128xf32> to vector<1x1x128xf32>
    tpu.vector_store %arg7[%c1_15, %c0_16, %c0_17], %24 {strides = array<i32>} : memref<2x8x128xf32, #tpu.memory_space<vmem>>, vector<1x1x128xf32>,
    %c0_i32_18 = arith.constant 0 : i32
    %25 = arith.cmpi eq, %arg1, %c0_i32_18 : i32
    %26 = arith.extui %25 : i1 to i32
    %c0_i32_19 = arith.constant 0 : i32
    %27 = arith.cmpi ne, %26, %c0_i32_19 : i32
    scf.if %27 {
      %c0_20 = arith.constant 0 : index
      %c0_21 = arith.constant 0 : index
      %c0_22 = arith.constant 0 : index
      %28 = vector.load %arg7[%c0_20, %c0_21, %c0_22] : memref<2x8x128xf32, #tpu.memory_space<vmem>>, vector<1x8x128xf32>
      %29 = vector.shape_cast %28 : vector<1x8x128xf32> to vector<8x128xf32>
      %cst_23 = arith.constant dense<0.000000e+00> : vector<8xf32>
      %30 = vector.multi_reduction <add>, %29, %cst_23 [1] : vector<8x128xf32> to vector<8xf32>
      %31 = vector.shape_cast %30 : vector<8xf32> to vector<8x1xf32>
      %c1_24 = arith.constant 1 : index
      %c0_25 = arith.constant 0 : index
      %c0_26 = arith.constant 0 : index
      %32 = vector.load %arg7[%c1_24, %c0_25, %c0_26] : memref<2x8x128xf32, #tpu.memory_space<vmem>>, vector<1x8x128xf32>
      %33 = vector.shape_cast %32 : vector<1x8x128xf32> to vector<8x128xf32>
      %cst_27 = arith.constant dense<0.000000e+00> : vector<8xf32>
      %34 = vector.multi_reduction <add>, %33, %cst_27 [1] : vector<8x128xf32> to vector<8xf32>
      %35 = vector.shape_cast %34 : vector<8xf32> to vector<8x1xf32>
      %cst_28 = arith.constant dense<0.000000e+00> : vector<1xf32>
      %36 = vector.multi_reduction <add>, %31, %cst_28 [0] : vector<8x1xf32> to vector<1xf32>
      %37 = vector.shape_cast %36 : vector<1xf32> to vector<1x1xf32>
      %c0_29 = arith.constant 0 : index
      %c0_30 = arith.constant 0 : index
      %c0_31 = arith.constant 0 : index
      %38 = vector.load %arg5[%c0_29, %c0_30, %c0_31] : memref<1x1x1xf32, #tpu.memory_space<vmem>>, vector<1x1x1xf32>
      %39 = vector.shape_cast %38 : vector<1x1x1xf32> to vector<1x1xf32>
      %40 = vector.shape_cast %37 : vector<1x1xf32> to vector<1x1x1xf32>
      tpu.vector_store %arg5[%c0_29, %c0_30, %c0_31], %40 {strides = array<i32>} : memref<1x1x1xf32, #tpu.memory_space<vmem>>, vector<1x1x1xf32>,
      %cst_32 = arith.constant dense<0.000000e+00> : vector<1xf32>
      %41 = vector.multi_reduction <add>, %35, %cst_32 [0] : vector<8x1xf32> to vector<1xf32>
      %42 = vector.shape_cast %41 : vector<1xf32> to vector<1x1xf32>
      %c0_33 = arith.constant 0 : index
      %c0_34 = arith.constant 0 : index
      %c0_35 = arith.constant 0 : index
      %43 = vector.load %arg6[%c0_33, %c0_34, %c0_35] : memref<1x1x1xf32, #tpu.memory_space<vmem>>, vector<1x1x1xf32>
      %44 = vector.shape_cast %43 : vector<1x1x1xf32> to vector<1x1xf32>
      %45 = vector.shape_cast %42 : vector<1x1xf32> to vector<1x1x1xf32>
      tpu.vector_store %arg6[%c0_33, %c0_34, %c0_35], %45 {strides = array<i32>} : memref<1x1x1xf32, #tpu.memory_space<vmem>>, vector<1x1x1xf32>,
    } else {
    }
    return
  }
  func.func @transform_0(%arg0: i32, %arg1: i32) -> (i32, i32) {
    %c1_i32 = arith.constant 1 : i32
    %0 = arith.muli %arg0, %c1_i32 : i32
    %1 = arith.addi %0, %arg1 : i32
    %c0_i32 = arith.constant 0 : i32
    %c0_i32_0 = arith.constant 0 : i32
    return %1, %c0_i32 : i32, i32
  }
  func.func @transform_1(%arg0: i32, %arg1: i32) -> (i32, i32) {
    %c1_i32 = arith.constant 1 : i32
    %0 = arith.muli %arg0, %c1_i32 : i32
    %1 = arith.addi %0, %arg1 : i32
    %c0_i32 = arith.constant 0 : i32
    %c0_i32_0 = arith.constant 0 : i32
    return %1, %c0_i32 : i32, i32
  }
  func.func @transform_2(%arg0: i32, %arg1: i32) -> (i32, i32) {
    %c1_i32 = arith.constant 1 : i32
    %0 = arith.muli %arg0, %c1_i32 : i32
    %1 = arith.addi %0, %arg1 : i32
    %c0_i32 = arith.constant 0 : i32
    %c0_i32_0 = arith.constant 0 : i32
    return %1, %c0_i32 : i32, i32
  }
  func.func @transform_3(%arg0: i32, %arg1: i32) -> (i32, i32, i32) {
    %c0_i32 = arith.constant 0 : i32
    %c0_i32_0 = arith.constant 0 : i32
    %c0_i32_1 = arith.constant 0 : i32
    return %arg0, %c0_i32, %c0_i32_0 : i32, i32, i32
  }
  func.func @transform_4(%arg0: i32, %arg1: i32) -> (i32, i32, i32) {
    %c0_i32 = arith.constant 0 : i32
    %c0_i32_0 = arith.constant 0 : i32
    %c0_i32_1 = arith.constant 0 : i32
    return %arg0, %c0_i32, %c0_i32_0 : i32, i32, i32
  }
}

</mosaic_0001>

<bundles_post_ra>
// kernel: tpu_custom_call.1
= control target key start
LH: loop header
LB: loop body
LE: loop exit
PB: predicated region body
PF: predicated region fallthrough
CT: control target
= control target key end

     0   :  { %10 = vsyncpa [#allocation4], 0  ;;  %s291_s0 = inlined_call_operand.hbm [shape: f32[1,128], index: 0, kind: input, shape index: {}]   ;;  %s292_s1 = inlined_call_operand.vmem [shape: f32[1,128], index: 1, kind: input, shape index: {}]   ;;  %s293_s2 = inlined_call_operand.vmem [shape: f32[1,128], index: 2, kind: input, shape index: {}]   ;;  %s294_s3 = inlined_call_operand.hbm [shape: f32[1,1,1], index: 3, kind: output, shape index: {0}]   ;;  %s295_s4 = inlined_call_operand.hbm [shape: f32[1,1,1], index: 4, kind: output, shape index: {1}]  }
   0x1   :  { %11 = vsyncpa [#allocation5], 0 }
   0x2   :  { %12 = vsyncpa [#allocation8], 0  ;;  %s218_s15 = smov [#allocation3]   ;;  %s146_s19 = scalar_lea.hbm %s291_s0, 16 }
   0x3   :  { %s22_s16 = sshll.u32 %s218_s15, 4  ;;  %p147_p0 = scmp.ne.s32.totalorder %s291_s0, %s146_s19  ;;  %s23_s16 = int_to_ptr.vmem [resolvable:$true] %s22_s16 }
   0x4   :  { %p150_p1 = scmp.lt.u32.totalorder %s146_s19, %s291_s0 }
   0x6   :  { %p152_p2 = pnand %p150_p1, %p147_p0 }
   0x8   :  { %155 = shalt.err (!%p152_p2)
}
   0x9   :  { %s156_s24 = scalar_lea.vmem %s23_s16, 16  ;;  %s160_s25 = scalar_lea.vmem %s23_s16, 32 }
   0xa   :  { %p157_p3 = scmp.ne.s32.totalorder %s23_s16, %s156_s24  ;;  %p161_p4 = scmp.lt.s32.totalorder %s23_s16, %s23_s16 }
   0xb   :  { %p162_p5 = scmp.lt.s32.totalorder %s160_s25, %s156_s24 }
   0xd   :  { %p163_p6 = por %p162_p5, %p161_p4 }
   0xf   :  { %p164_p7 = pnand %p163_p6, %p157_p3 }
  0x11   :  { %167 = shalt.err (!%p164_p7)
}
  0x12   :  { %25 = dma.hbm_to_vmem [thread:$0]  %s291_s0, 16, %s23_s16, [#allocation4]  }
  0x13   :  { %212 = dma.done.wait [#allocation4], 16  }
  0x14   :  { %213 = vsyncadd [#allocation4], 4294967280  ;;  %v219_v0 = vmov 0.0   ;;  %v68_v1 = vld [vmem:[#allocation3] sm:$0x1]  ;;  %s220_s0 = smov [#allocation6]  }
  0x15   :  { %66 = vst [vmem:[#allocation2] sm:$0xff] %v219_v0  ;;  %67 = vst [vmem:[#allocation2 + $0x8] sm:$0xff] %v219_v0  ;;  %v69_v2 = vld [vmem:[%s292_s1] sm:$0x1]  ;;  %s113_s1 = sshll.u32 %s220_s0, 4  ;;  %vm98_vm0 = vcmask 0   ;;  %s114_s1 = int_to_ptr.vmem [resolvable:$true] %s113_s1 }
  0x16   :  { %v70_v3 = vld [vmem:[%s293_s2] sm:$0x1]  ;;  %s221_s2 = smov [#allocation7]   ;;  %s168_s7 = scalar_lea.vmem %s114_s1, 16 }
  0x17   :  { %v71_v4 = vmul.f32 %v70_v3, %v68_v1  ;;  %s123_s6 = sshll.u32 %s221_s2, 4  ;;  %p169_p8 = scmp.ne.s32.totalorder %s114_s1, %s168_s7  ;;  %s124_s6 = int_to_ptr.vmem [resolvable:$true] %s123_s6 }
  0x18   :  { %s172_s8 = scalar_lea.vmem %s114_s1, 32  ;;  %p173_p9 = scmp.lt.s32.totalorder %s114_s1, %s114_s1 }
  0x19   :  { %v72_v7 = vsub.f32 %v71_v4, %v69_v2  ;;  %p174_p10 = scmp.lt.s32.totalorder %s172_s8, %s168_s7 }
  0x1b   :  { %v73_v9 = vmul.f32 %v72_v7, %v72_v7  ;;  %p175_p11 = por %p174_p10, %p173_p9 }
  0x1c   :  { %v79_v5 = vld [vmem:[#allocation2 + $0x8] sm:$0x1]  ;;  %v74_v8 = vld [vmem:[#allocation2] sm:$0x1] }
  0x1d   :  { %v81_v6 = vadd.f32 %v79_v5, %v70_v3  ;;  %v76_v10 = vadd.f32 %v74_v8, %v73_v9  ;;  %p176_p12 = pnand %p175_p11, %p169_p8 }
  0x1f   :  { %82 = vst [vmem:[#allocation2 + $0x8] sm:$0x1] %v81_v6  ;;  %77 = vst [vmem:[#allocation2] sm:$0x1] %v76_v10 }
  0x26   :  { %v86_v11 = vld [vmem:[#allocation2] sm:$0xff]  ;;  %v89_v12 = vld [vmem:[#allocation2 + $0x8] sm:$0xff] }
  0x27   :  { %87 = vadd.xlane.f32.xlu0 %v86_v11 }
  0x2b   :  { %90 = vadd.xlane.f32.xlu0 %v89_v12 }
  0xb4   :  { %v88_v13 = vpop.xlane.xlu0 %87 }
  0xb5   :  { %v92_v14 = vrot.slane %v88_v13, 4 }
  0xb7   :  { %v93_v15 = vadd.f32 %v92_v14, %v88_v13 }
  0xb8   :  { %v91_v16 = vpop.xlane.xlu0 %90 }
  0xb9   :  { %v94_v17 = vrot.slane %v93_v15, 2  ;;  %v100_v18 = vrot.slane %v91_v16, 4 }
  0xbb   :  { %v95_v19 = vadd.f32 %v94_v17, %v93_v15  ;;  %v101_v20 = vadd.f32 %v100_v18, %v91_v16 }
  0xbd   :  { %v96_v21 = vrot.slane %v95_v19, 1  ;;  %v102_v22 = vrot.slane %v101_v20, 2 }
  0xbf   :  { %v97_v23 = vadd.f32 %v96_v21, %v95_v19  ;;  %v103_v24 = vadd.f32 %v102_v22, %v101_v20 }
  0xc1   :  { %v104_v25 = vrot.slane %v103_v24, 1  ;;  %99 = vst.msk [vmem:[#allocation6] sm:$0x1] %vm98_vm0, %v97_v23 }
  0xc2   :  { %179 = shalt.err (!%p176_p12)
}
  0xc3   :  { %s180_s11 = scalar_lea.hbm %s294_s3, 16 }
  0xc4   :  { %p181_p13 = scmp.ne.s32.totalorder %s294_s3, %s180_s11  ;;  %p184_p0 = scmp.lt.u32.totalorder %s180_s11, %s294_s3 }
  0xc6   :  { %p186_p1 = pnand %p184_p0, %p181_p13 }
  0xc8   :  { %189 = shalt.err (!%p186_p1)
}
  0xc9   :  { %116 = dma.vmem_to_hbm [thread:$0]  %s114_s1, 16, %s294_s3, [#allocation5]   ;;  %v105_v26 = vadd.f32 %v104_v25, %v103_v24 }
  0xca   :  { %s190_s18 = scalar_lea.vmem %s124_s6, 16  ;;  %s194_s19 = scalar_lea.vmem %s124_s6, 32 }
  0xcb   :  { %106 = vst.msk [vmem:[#allocation7] sm:$0x1] %vm98_vm0, %v105_v26  ;;  %p191_p2 = scmp.ne.s32.totalorder %s124_s6, %s190_s18  ;;  %p195_p3 = scmp.lt.s32.totalorder %s124_s6, %s124_s6 }
  0xcc   :  { %p196_p4 = scmp.lt.s32.totalorder %s194_s19, %s190_s18 }
  0xce   :  { %p197_p5 = por %p196_p4, %p195_p3 }
  0xd0   :  { %p198_p6 = pnand %p197_p5, %p191_p2 }
  0xd2   :  { %201 = shalt.err (!%p198_p6)
}
  0xd3   :  { %s202_s22 = scalar_lea.hbm %s295_s4, 16 }
  0xd4   :  { %p203_p7 = scmp.ne.s32.totalorder %s295_s4, %s202_s22  ;;  %p206_p8 = scmp.lt.u32.totalorder %s202_s22, %s295_s4 }
  0xd6   :  { %p208_p9 = pnand %p206_p8, %p203_p7 }
  0xd8   :  { %211 = shalt.err (!%p208_p9)
}
  0xd9   :  { %126 = dma.vmem_to_hbm [thread:$0]  %s124_s6, 16, %s295_s4, [#allocation8]  }
  0xda   :  { %214 = dma.done.wait [#allocation5], 16  }
  0xdb   :  { %215 = vsyncadd [#allocation5], 4294967280 }
  0xdc   :  { %216 = dma.done.wait [#allocation8], 16  }
  0xdd   :  { %217 = vsyncadd [#allocation8], 4294967280 }
  0xde   :  { %133 = vsyncpa [#allocation4], 1 }
  0xdf   :  { %134 = vsyncpa [#allocation5], 1 }
  0xe0   :  { %135 = vsyncpa [#allocation8], 1 }

</bundles_post_ra>
